<compile_context>
chip_gen: v7x
topology: tpu7x:2x2x1
jax: 0.10.0
libtpu: 0.0.40
codegen_flags: <defaults>
</compile_context>

<pallas_src>
import jax
import jax.numpy as jnp
from jax import lax
from jax.experimental import pallas as pl
from jax.experimental.pallas import tpu as pltpu

# ------------------------- configuration (small, synthetic) -----------------
BATCH = 2
SEQ = 16
HIDDEN = 32
NUM_HEADS = 4
HEAD_DIM = HIDDEN // NUM_HEADS
SCALE = HEAD_DIM ** (-0.5)
ATTN_DROPOUT = 0.0  # eval mode -> dropout is identity


# ------------------------------ Pallas kernel -------------------------------
def siglip_attention_kernel(x_ref, wqkv_ref, bqkv_ref, wo_ref, bo_ref,
                            out_ref, attw_ref):
    x = x_ref[...]                                                 # (B*S, D)

    # Fused Q/K/V projection: one MXU matmul; columns are [ Q | K | V ].
    qkv = (jnp.dot(x, wqkv_ref[...], preferred_element_type=jnp.float32)
           + bqkv_ref[...])                                        # (B*S, 3D)

    ctx_rows = []    # per-batch (S, D) context blocks
    attw_cols = []   # per-(b, h) (S, S) softmax matrices (lane-concatenated)
    for b in range(BATCH):                     # static unroll: no grid needed
        r0 = b * SEQ
        head_ctx = []
        for h in range(NUM_HEADS):             # static unroll over heads
            c0 = h * HEAD_DIM
            q_bh = qkv[r0:r0 + SEQ, c0:c0 + HEAD_DIM]                     # (S, hd)
            k_bh = qkv[r0:r0 + SEQ, HIDDEN + c0:HIDDEN + c0 + HEAD_DIM]   # (S, hd)
            v_bh = qkv[r0:r0 + SEQ, 2 * HIDDEN + c0:2 * HIDDEN + c0 + HEAD_DIM]

            # q @ k^T via dot_general (trans_b form -> no explicit transpose).
            scores = lax.dot_general(
                q_bh, k_bh, (((1,), (1,)), ((), ())),
                preferred_element_type=jnp.float32) * SCALE               # (S, S)

            # softmax in float32 (matches torch softmax(dtype=float32)).
            m = jnp.max(scores, axis=-1, keepdims=True)
            e = jnp.exp(scores - m)
            denom = jnp.sum(e, axis=-1, keepdims=True)
            attn = e * pl.reciprocal(denom, approx=False)                 # (S, S) f32
            # dropout(p=ATTN_DROPOUT) in eval mode is identity (skipped).

            head_ctx.append(
                jnp.dot(attn, v_bh, preferred_element_type=jnp.float32))  # (S, hd)
            attw_cols.append(attn)

        ctx_rows.append(jnp.concatenate(head_ctx, axis=1))                # (S, D)

    # Merge heads/batches and run the output projection as one matmul.
    ctx = jnp.concatenate(ctx_rows, axis=0).astype(x.dtype)               # (B*S, D)
    out = (jnp.dot(ctx, wo_ref[...], preferred_element_type=jnp.float32)
           + bo_ref[...])                                                 # (B*S, D)

    out_ref[...] = out.astype(out_ref.dtype)
    # Lane-dense (S, B*H*S) = (16, 128) attention-weight slab: one dense store.
    attw_ref[...] = jnp.concatenate(attw_cols, axis=1).astype(attw_ref.dtype)


# ------------------------------ Python wrapper -------------------------------
def prepare_params(params):
    """One-time weight prep (outside the per-call path): fuse QKV, transpose."""
    wqkv = jnp.concatenate(
        [params["wq"].T, params["wk"].T, params["wv"].T], axis=1)   # (D, 3D)
    bqkv = jnp.concatenate(
        [params["bq"], params["bk"], params["bv"]]).reshape(1, 3 * HIDDEN)
    wo_t = params["wo"].T                                           # (D, D)
    bo = params["bo"].reshape(1, HIDDEN)
    return wqkv, bqkv, wo_t, bo


def siglip_attention(x, wqkv, bqkv, wo_t, bo):
    """x: (B, S, D) float32; weights pre-fused/transposed by prepare_params."""
    B, S, D = x.shape
    assert B == BATCH and S == SEQ and D == HIDDEN

    xf = x.reshape(B * S, D)

    out_shape = (
        jax.ShapeDtypeStruct((B * S, D), x.dtype),               # attn_output (flat)
        jax.ShapeDtypeStruct((S, B * NUM_HEADS * S), x.dtype),   # attn_weights slab
    )

    vmem = pl.BlockSpec(memory_space=pltpu.MemorySpace.VMEM)
    out_flat, attw_flat = pl.pallas_call(
        siglip_attention_kernel,
        out_shape=out_shape,
        in_specs=[vmem, vmem, vmem, vmem, vmem],
        out_specs=(vmem, vmem),
    )(xf, wqkv, bqkv, wo_t, bo)

    out = out_flat.reshape(B, S, D)
    # slab column layout: ((b * H + h) * S + k)  ->  (B, H, S, S)
    attw = attw_flat.reshape(S, B, NUM_HEADS, S).transpose(1, 2, 0, 3)
    return out, attw


# ------------------------------ reference (plain JAX) ------------------------
def siglip_attention_ref(x, params):
    B, S, D = x.shape

    def lin(t, w, b):
        return t @ w.T + b

    q = lin(x, params["wq"], params["bq"]).reshape(B, S, NUM_HEADS, HEAD_DIM).transpose(0, 2, 1, 3)
    k = lin(x, params["wk"], params["bk"]).reshape(B, S, NUM_HEADS, HEAD_DIM).transpose(0, 2, 1, 3)
    v = lin(x, params["wv"], params["bv"]).reshape(B, S, NUM_HEADS, HEAD_DIM).transpose(0, 2, 1, 3)
    scores = jnp.einsum("bhqd,bhkd->bhqk", q, k) * SCALE
    attn = jax.nn.softmax(scores.astype(jnp.float32), axis=-1).astype(x.dtype)
    ctx = jnp.einsum("bhqk,bhkd->bhqd", attn, v)
    ctx = ctx.transpose(0, 2, 1, 3).reshape(B, S, D)
    out = lin(ctx, params["wo"], params["bo"])
    return out, attn


# ------------------------------------ main -----------------------------------
if __name__ == "__main__":
    key = jax.random.PRNGKey(0)
    keys = jax.random.split(key, 9)

    def init_linear(kw, kb, fan_in, fan_out):
        lim = 1.0 / (fan_in ** 0.5)
        w = jax.random.uniform(kw, (fan_out, fan_in), jnp.float32, -lim, lim)
        b = jax.random.uniform(kb, (fan_out,), jnp.float32, -lim, lim)
        return w, b

    wq, bq = init_linear(keys[0], keys[1], HIDDEN, HIDDEN)
    wk, bk = init_linear(keys[2], keys[3], HIDDEN, HIDDEN)
    wv, bv = init_linear(keys[4], keys[5], HIDDEN, HIDDEN)
    wo, bo = init_linear(keys[6], keys[7], HIDDEN, HIDDEN)
    params = dict(wq=wq, bq=bq, wk=wk, bk=bk, wv=wv, bv=bv, wo=wo, bo=bo)

    x = jax.random.normal(keys[8], (BATCH, SEQ, HIDDEN), jnp.float32)

    # One-time weight fusion/transposition (outside the call path).
    prepped = jax.tree_util.tree_map(jax.block_until_ready, prepare_params(params))

    out, attw = siglip_attention(x, *prepped)
    out = jax.block_until_ready(out)
    attw = jax.block_until_ready(attw)

    out_expected, attw_expected = siglip_attention_ref(x, params)
    assert jnp.allclose(out, out_expected, atol=1e-4, rtol=1e-4), "attn_output mismatch"
    assert jnp.allclose(attw, attw_expected, atol=1e-5, rtol=1e-4), "attn_weights mismatch"

    print("KERNEL_OK")
</pallas_src>

<mosaic_0001>
module attributes {stable_mosaic.version = 11 : i64} {
  func.func @siglip_attention_kernel(%arg0: memref<32x32xf32, #tpu.memory_space<vmem>>, %arg1: memref<32x96xf32, #tpu.memory_space<vmem>>, %arg2: memref<1x96xf32, #tpu.memory_space<vmem>>, %arg3: memref<32x32xf32, #tpu.memory_space<vmem>>, %arg4: memref<1x32xf32, #tpu.memory_space<vmem>>, %arg5: memref<32x32xf32, #tpu.memory_space<vmem>>, %arg6: memref<16x128xf32, #tpu.memory_space<vmem>>) attributes {dimension_semantics = [], scalar_prefetch = 0 : i64, scratch_operands = 0 : i64, tpu.core_type = #tpu.core_type<tc>} {
    %c0 = arith.constant 0 : index
    %c0_0 = arith.constant 0 : index
    %0 = vector.load %arg0[%c0, %c0_0] : memref<32x32xf32, #tpu.memory_space<vmem>>, vector<32x32xf32>
    %c0_1 = arith.constant 0 : index
    %c0_2 = arith.constant 0 : index
    %1 = vector.load %arg1[%c0_1, %c0_2] : memref<32x96xf32, #tpu.memory_space<vmem>>, vector<32x96xf32>
    %cst = arith.constant dense<0.000000e+00> : vector<32x96xf32>
    %2 = tpu.matmul %0, %1, %cst {dimension_numbers = #tpu.dot_dimension_numbers<[1], [0], [0], [1], [0, 0, 1, 1], [], []>} : vector<32x32xf32>, vector<32x96xf32>, vector<32x96xf32> -> vector<32x96xf32>
    %c0_3 = arith.constant 0 : index
    %c0_4 = arith.constant 0 : index
    %3 = vector.load %arg2[%c0_3, %c0_4] : memref<1x96xf32, #tpu.memory_space<vmem>>, vector<1x96xf32>
    %4 = vector.broadcast %3 : vector<1x96xf32> to vector<32x96xf32>
    %5 = arith.addf %2, %4 : vector<32x96xf32>
    %6 = vector.extract_strided_slice %5 {offsets = [0, 0], sizes = [16, 8], strides = [1, 1]} : vector<32x96xf32> to vector<16x8xf32>
    %7 = vector.extract_strided_slice %5 {offsets = [0, 32], sizes = [16, 8], strides = [1, 1]} : vector<32x96xf32> to vector<16x8xf32>
    %8 = vector.extract_strided_slice %5 {offsets = [0, 64], sizes = [16, 8], strides = [1, 1]} : vector<32x96xf32> to vector<16x8xf32>
    %cst_5 = arith.constant dense<0.000000e+00> : vector<16x16xf32>
    %9 = tpu.matmul %6, %7, %cst_5 {dimension_numbers = #tpu.dot_dimension_numbers<[1], [1], [0], [0], [0, 0, 1, 0], [], []>} : vector<16x8xf32>, vector<16x8xf32>, vector<16x16xf32> -> vector<16x16xf32>
    %cst_6 = arith.constant 0.353553385 : f32
    %10 = vector.broadcast %cst_6 : f32 to vector<16x16xf32>
    %11 = arith.mulf %9, %10 : vector<16x16xf32>
    %cst_7 = arith.constant dense<0xFF800000> : vector<16xf32>
    %12 = vector.multi_reduction <maximumf>, %11, %cst_7 [1] : vector<16x16xf32> to vector<16xf32>
    %13 = vector.shape_cast %12 : vector<16xf32> to vector<16x1xf32>
    %14 = vector.broadcast %13 : vector<16x1xf32> to vector<16x16xf32>
    %15 = arith.subf %11, %14 : vector<16x16xf32>
    %16 = math.exp %15 : vector<16x16xf32>
    %cst_8 = arith.constant dense<0.000000e+00> : vector<16xf32>
    %17 = vector.multi_reduction <add>, %16, %cst_8 [1] : vector<16x16xf32> to vector<16xf32>
    %18 = vector.shape_cast %17 : vector<16xf32> to vector<16x1xf32>
    %19 = tpu.reciprocal %18 : vector<16x1xf32> -> vector<16x1xf32>
    %20 = vector.broadcast %19 : vector<16x1xf32> to vector<16x16xf32>
    %21 = arith.mulf %16, %20 : vector<16x16xf32>
    %cst_9 = arith.constant dense<0.000000e+00> : vector<16x8xf32>
    %22 = tpu.matmul %21, %8, %cst_9 {dimension_numbers = #tpu.dot_dimension_numbers<[1], [0], [0], [1], [0, 0, 1, 1], [], []>} : vector<16x16xf32>, vector<16x8xf32>, vector<16x8xf32> -> vector<16x8xf32>
    %23 = vector.extract_strided_slice %5 {offsets = [0, 8], sizes = [16, 8], strides = [1, 1]} : vector<32x96xf32> to vector<16x8xf32>
    %24 = vector.extract_strided_slice %5 {offsets = [0, 40], sizes = [16, 8], strides = [1, 1]} : vector<32x96xf32> to vector<16x8xf32>
    %25 = vector.extract_strided_slice %5 {offsets = [0, 72], sizes = [16, 8], strides = [1, 1]} : vector<32x96xf32> to vector<16x8xf32>
    %cst_10 = arith.constant dense<0.000000e+00> : vector<16x16xf32>
    %26 = tpu.matmul %23, %24, %cst_10 {dimension_numbers = #tpu.dot_dimension_numbers<[1], [1], [0], [0], [0, 0, 1, 0], [], []>} : vector<16x8xf32>, vector<16x8xf32>, vector<16x16xf32> -> vector<16x16xf32>
    %cst_11 = arith.constant 0.353553385 : f32
    %27 = vector.broadcast %cst_11 : f32 to vector<16x16xf32>
    %28 = arith.mulf %26, %27 : vector<16x16xf32>
    %cst_12 = arith.constant dense<0xFF800000> : vector<16xf32>
    %29 = vector.multi_reduction <maximumf>, %28, %cst_12 [1] : vector<16x16xf32> to vector<16xf32>
    %30 = vector.shape_cast %29 : vector<16xf32> to vector<16x1xf32>
    %31 = vector.broadcast %30 : vector<16x1xf32> to vector<16x16xf32>
    %32 = arith.subf %28, %31 : vector<16x16xf32>
    %33 = math.exp %32 : vector<16x16xf32>
    %cst_13 = arith.constant dense<0.000000e+00> : vector<16xf32>
    %34 = vector.multi_reduction <add>, %33, %cst_13 [1] : vector<16x16xf32> to vector<16xf32>
    %35 = vector.shape_cast %34 : vector<16xf32> to vector<16x1xf32>
    %36 = tpu.reciprocal %35 : vector<16x1xf32> -> vector<16x1xf32>
    %37 = vector.broadcast %36 : vector<16x1xf32> to vector<16x16xf32>
    %38 = arith.mulf %33, %37 : vector<16x16xf32>
    %cst_14 = arith.constant dense<0.000000e+00> : vector<16x8xf32>
    %39 = tpu.matmul %38, %25, %cst_14 {dimension_numbers = #tpu.dot_dimension_numbers<[1], [0], [0], [1], [0, 0, 1, 1], [], []>} : vector<16x16xf32>, vector<16x8xf32>, vector<16x8xf32> -> vector<16x8xf32>
    %40 = vector.extract_strided_slice %5 {offsets = [0, 16], sizes = [16, 8], strides = [1, 1]} : vector<32x96xf32> to vector<16x8xf32>
    %41 = vector.extract_strided_slice %5 {offsets = [0, 48], sizes = [16, 8], strides = [1, 1]} : vector<32x96xf32> to vector<16x8xf32>
    %42 = vector.extract_strided_slice %5 {offsets = [0, 80], sizes = [16, 8], strides = [1, 1]} : vector<32x96xf32> to vector<16x8xf32>
    %cst_15 = arith.constant dense<0.000000e+00> : vector<16x16xf32>
    %43 = tpu.matmul %40, %41, %cst_15 {dimension_numbers = #tpu.dot_dimension_numbers<[1], [1], [0], [0], [0, 0, 1, 0], [], []>} : vector<16x8xf32>, vector<16x8xf32>, vector<16x16xf32> -> vector<16x16xf32>
    %cst_16 = arith.constant 0.353553385 : f32
    %44 = vector.broadcast %cst_16 : f32 to vector<16x16xf32>
    %45 = arith.mulf %43, %44 : vector<16x16xf32>
    %cst_17 = arith.constant dense<0xFF800000> : vector<16xf32>
    %46 = vector.multi_reduction <maximumf>, %45, %cst_17 [1] : vector<16x16xf32> to vector<16xf32>
    %47 = vector.shape_cast %46 : vector<16xf32> to vector<16x1xf32>
    %48 = vector.broadcast %47 : vector<16x1xf32> to vector<16x16xf32>
    %49 = arith.subf %45, %48 : vector<16x16xf32>
    %50 = math.exp %49 : vector<16x16xf32>
    %cst_18 = arith.constant dense<0.000000e+00> : vector<16xf32>
    %51 = vector.multi_reduction <add>, %50, %cst_18 [1] : vector<16x16xf32> to vector<16xf32>
    %52 = vector.shape_cast %51 : vector<16xf32> to vector<16x1xf32>
    %53 = tpu.reciprocal %52 : vector<16x1xf32> -> vector<16x1xf32>
    %54 = vector.broadcast %53 : vector<16x1xf32> to vector<16x16xf32>
    %55 = arith.mulf %50, %54 : vector<16x16xf32>
    %cst_19 = arith.constant dense<0.000000e+00> : vector<16x8xf32>
    %56 = tpu.matmul %55, %42, %cst_19 {dimension_numbers = #tpu.dot_dimension_numbers<[1], [0], [0], [1], [0, 0, 1, 1], [], []>} : vector<16x16xf32>, vector<16x8xf32>, vector<16x8xf32> -> vector<16x8xf32>
    %57 = vector.extract_strided_slice %5 {offsets = [0, 24], sizes = [16, 8], strides = [1, 1]} : vector<32x96xf32> to vector<16x8xf32>
    %58 = vector.extract_strided_slice %5 {offsets = [0, 56], sizes = [16, 8], strides = [1, 1]} : vector<32x96xf32> to vector<16x8xf32>
    %59 = vector.extract_strided_slice %5 {offsets = [0, 88], sizes = [16, 8], strides = [1, 1]} : vector<32x96xf32> to vector<16x8xf32>
    %cst_20 = arith.constant dense<0.000000e+00> : vector<16x16xf32>
    %60 = tpu.matmul %57, %58, %cst_20 {dimension_numbers = #tpu.dot_dimension_numbers<[1], [1], [0], [0], [0, 0, 1, 0], [], []>} : vector<16x8xf32>, vector<16x8xf32>, vector<16x16xf32> -> vector<16x16xf32>
    %cst_21 = arith.constant 0.353553385 : f32
    %61 = vector.broadcast %cst_21 : f32 to vector<16x16xf32>
    %62 = arith.mulf %60, %61 : vector<16x16xf32>
    %cst_22 = arith.constant dense<0xFF800000> : vector<16xf32>
    %63 = vector.multi_reduction <maximumf>, %62, %cst_22 [1] : vector<16x16xf32> to vector<16xf32>
    %64 = vector.shape_cast %63 : vector<16xf32> to vector<16x1xf32>
    %65 = vector.broadcast %64 : vector<16x1xf32> to vector<16x16xf32>
    %66 = arith.subf %62, %65 : vector<16x16xf32>
    %67 = math.exp %66 : vector<16x16xf32>
    %cst_23 = arith.constant dense<0.000000e+00> : vector<16xf32>
    %68 = vector.multi_reduction <add>, %67, %cst_23 [1] : vector<16x16xf32> to vector<16xf32>
    %69 = vector.shape_cast %68 : vector<16xf32> to vector<16x1xf32>
    %70 = tpu.reciprocal %69 : vector<16x1xf32> -> vector<16x1xf32>
    %71 = vector.broadcast %70 : vector<16x1xf32> to vector<16x16xf32>
    %72 = arith.mulf %67, %71 : vector<16x16xf32>
    %cst_24 = arith.constant dense<0.000000e+00> : vector<16x8xf32>
    %73 = tpu.matmul %72, %59, %cst_24 {dimension_numbers = #tpu.dot_dimension_numbers<[1], [0], [0], [1], [0, 0, 1, 1], [], []>} : vector<16x16xf32>, vector<16x8xf32>, vector<16x8xf32> -> vector<16x8xf32>
    %74 = tpu.concatenate %22, %39, %56, %73 in 1 : vector<16x8xf32>, vector<16x8xf32>, vector<16x8xf32>, vector<16x8xf32> -> vector<16x32xf32>
    %75 = vector.extract_strided_slice %5 {offsets = [16, 0], sizes = [16, 8], strides = [1, 1]} : vector<32x96xf32> to vector<16x8xf32>
    %76 = vector.extract_strided_slice %5 {offsets = [16, 32], sizes = [16, 8], strides = [1, 1]} : vector<32x96xf32> to vector<16x8xf32>
    %77 = vector.extract_strided_slice %5 {offsets = [16, 64], sizes = [16, 8], strides = [1, 1]} : vector<32x96xf32> to vector<16x8xf32>
    %cst_25 = arith.constant dense<0.000000e+00> : vector<16x16xf32>
    %78 = tpu.matmul %75, %76, %cst_25 {dimension_numbers = #tpu.dot_dimension_numbers<[1], [1], [0], [0], [0, 0, 1, 0], [], []>} : vector<16x8xf32>, vector<16x8xf32>, vector<16x16xf32> -> vector<16x16xf32>
    %cst_26 = arith.constant 0.353553385 : f32
    %79 = vector.broadcast %cst_26 : f32 to vector<16x16xf32>
    %80 = arith.mulf %78, %79 : vector<16x16xf32>
    %cst_27 = arith.constant dense<0xFF800000> : vector<16xf32>
    %81 = vector.multi_reduction <maximumf>, %80, %cst_27 [1] : vector<16x16xf32> to vector<16xf32>
    %82 = vector.shape_cast %81 : vector<16xf32> to vector<16x1xf32>
    %83 = vector.broadcast %82 : vector<16x1xf32> to vector<16x16xf32>
    %84 = arith.subf %80, %83 : vector<16x16xf32>
    %85 = math.exp %84 : vector<16x16xf32>
    %cst_28 = arith.constant dense<0.000000e+00> : vector<16xf32>
    %86 = vector.multi_reduction <add>, %85, %cst_28 [1] : vector<16x16xf32> to vector<16xf32>
    %87 = vector.shape_cast %86 : vector<16xf32> to vector<16x1xf32>
    %88 = tpu.reciprocal %87 : vector<16x1xf32> -> vector<16x1xf32>
    %89 = vector.broadcast %88 : vector<16x1xf32> to vector<16x16xf32>
    %90 = arith.mulf %85, %89 : vector<16x16xf32>
    %cst_29 = arith.constant dense<0.000000e+00> : vector<16x8xf32>
    %91 = tpu.matmul %90, %77, %cst_29 {dimension_numbers = #tpu.dot_dimension_numbers<[1], [0], [0], [1], [0, 0, 1, 1], [], []>} : vector<16x16xf32>, vector<16x8xf32>, vector<16x8xf32> -> vector<16x8xf32>
    %92 = vector.extract_strided_slice %5 {offsets = [16, 8], sizes = [16, 8], strides = [1, 1]} : vector<32x96xf32> to vector<16x8xf32>
    %93 = vector.extract_strided_slice %5 {offsets = [16, 40], sizes = [16, 8], strides = [1, 1]} : vector<32x96xf32> to vector<16x8xf32>
    %94 = vector.extract_strided_slice %5 {offsets = [16, 72], sizes = [16, 8], strides = [1, 1]} : vector<32x96xf32> to vector<16x8xf32>
    %cst_30 = arith.constant dense<0.000000e+00> : vector<16x16xf32>
    %95 = tpu.matmul %92, %93, %cst_30 {dimension_numbers = #tpu.dot_dimension_numbers<[1], [1], [0], [0], [0, 0, 1, 0], [], []>} : vector<16x8xf32>, vector<16x8xf32>, vector<16x16xf32> -> vector<16x16xf32>
    %cst_31 = arith.constant 0.353553385 : f32
    %96 = vector.broadcast %cst_31 : f32 to vector<16x16xf32>
    %97 = arith.mulf %95, %96 : vector<16x16xf32>
    %cst_32 = arith.constant dense<0xFF800000> : vector<16xf32>
    %98 = vector.multi_reduction <maximumf>, %97, %cst_32 [1] : vector<16x16xf32> to vector<16xf32>
    %99 = vector.shape_cast %98 : vector<16xf32> to vector<16x1xf32>
    %100 = vector.broadcast %99 : vector<16x1xf32> to vector<16x16xf32>
    %101 = arith.subf %97, %100 : vector<16x16xf32>
    %102 = math.exp %101 : vector<16x16xf32>
    %cst_33 = arith.constant dense<0.000000e+00> : vector<16xf32>
    %103 = vector.multi_reduction <add>, %102, %cst_33 [1] : vector<16x16xf32> to vector<16xf32>
    %104 = vector.shape_cast %103 : vector<16xf32> to vector<16x1xf32>
    %105 = tpu.reciprocal %104 : vector<16x1xf32> -> vector<16x1xf32>
    %106 = vector.broadcast %105 : vector<16x1xf32> to vector<16x16xf32>
    %107 = arith.mulf %102, %106 : vector<16x16xf32>
    %cst_34 = arith.constant dense<0.000000e+00> : vector<16x8xf32>
    %108 = tpu.matmul %107, %94, %cst_34 {dimension_numbers = #tpu.dot_dimension_numbers<[1], [0], [0], [1], [0, 0, 1, 1], [], []>} : vector<16x16xf32>, vector<16x8xf32>, vector<16x8xf32> -> vector<16x8xf32>
    %109 = vector.extract_strided_slice %5 {offsets = [16, 16], sizes = [16, 8], strides = [1, 1]} : vector<32x96xf32> to vector<16x8xf32>
    %110 = vector.extract_strided_slice %5 {offsets = [16, 48], sizes = [16, 8], strides = [1, 1]} : vector<32x96xf32> to vector<16x8xf32>
    %111 = vector.extract_strided_slice %5 {offsets = [16, 80], sizes = [16, 8], strides = [1, 1]} : vector<32x96xf32> to vector<16x8xf32>
    %cst_35 = arith.constant dense<0.000000e+00> : vector<16x16xf32>
    %112 = tpu.matmul %109, %110, %cst_35 {dimension_numbers = #tpu.dot_dimension_numbers<[1], [1], [0], [0], [0, 0, 1, 0], [], []>} : vector<16x8xf32>, vector<16x8xf32>, vector<16x16xf32> -> vector<16x16xf32>
    %cst_36 = arith.constant 0.353553385 : f32
    %113 = vector.broadcast %cst_36 : f32 to vector<16x16xf32>
    %114 = arith.mulf %112, %113 : vector<16x16xf32>
    %cst_37 = arith.constant dense<0xFF800000> : vector<16xf32>
    %115 = vector.multi_reduction <maximumf>, %114, %cst_37 [1] : vector<16x16xf32> to vector<16xf32>
    %116 = vector.shape_cast %115 : vector<16xf32> to vector<16x1xf32>
    %117 = vector.broadcast %116 : vector<16x1xf32> to vector<16x16xf32>
    %118 = arith.subf %114, %117 : vector<16x16xf32>
    %119 = math.exp %118 : vector<16x16xf32>
    %cst_38 = arith.constant dense<0.000000e+00> : vector<16xf32>
    %120 = vector.multi_reduction <add>, %119, %cst_38 [1] : vector<16x16xf32> to vector<16xf32>
    %121 = vector.shape_cast %120 : vector<16xf32> to vector<16x1xf32>
    %122 = tpu.reciprocal %121 : vector<16x1xf32> -> vector<16x1xf32>
    %123 = vector.broadcast %122 : vector<16x1xf32> to vector<16x16xf32>
    %124 = arith.mulf %119, %123 : vector<16x16xf32>
    %cst_39 = arith.constant dense<0.000000e+00> : vector<16x8xf32>
    %125 = tpu.matmul %124, %111, %cst_39 {dimension_numbers = #tpu.dot_dimension_numbers<[1], [0], [0], [1], [0, 0, 1, 1], [], []>} : vector<16x16xf32>, vector<16x8xf32>, vector<16x8xf32> -> vector<16x8xf32>
    %126 = vector.extract_strided_slice %5 {offsets = [16, 24], sizes = [16, 8], strides = [1, 1]} : vector<32x96xf32> to vector<16x8xf32>
    %127 = vector.extract_strided_slice %5 {offsets = [16, 56], sizes = [16, 8], strides = [1, 1]} : vector<32x96xf32> to vector<16x8xf32>
    %128 = vector.extract_strided_slice %5 {offsets = [16, 88], sizes = [16, 8], strides = [1, 1]} : vector<32x96xf32> to vector<16x8xf32>
    %cst_40 = arith.constant dense<0.000000e+00> : vector<16x16xf32>
    %129 = tpu.matmul %126, %127, %cst_40 {dimension_numbers = #tpu.dot_dimension_numbers<[1], [1], [0], [0], [0, 0, 1, 0], [], []>} : vector<16x8xf32>, vector<16x8xf32>, vector<16x16xf32> -> vector<16x16xf32>
    %cst_41 = arith.constant 0.353553385 : f32
    %130 = vector.broadcast %cst_41 : f32 to vector<16x16xf32>
    %131 = arith.mulf %129, %130 : vector<16x16xf32>
    %cst_42 = arith.constant dense<0xFF800000> : vector<16xf32>
    %132 = vector.multi_reduction <maximumf>, %131, %cst_42 [1] : vector<16x16xf32> to vector<16xf32>
    %133 = vector.shape_cast %132 : vector<16xf32> to vector<16x1xf32>
    %134 = vector.broadcast %133 : vector<16x1xf32> to vector<16x16xf32>
    %135 = arith.subf %131, %134 : vector<16x16xf32>
    %136 = math.exp %135 : vector<16x16xf32>
    %cst_43 = arith.constant dense<0.000000e+00> : vector<16xf32>
    %137 = vector.multi_reduction <add>, %136, %cst_43 [1] : vector<16x16xf32> to vector<16xf32>
    %138 = vector.shape_cast %137 : vector<16xf32> to vector<16x1xf32>
    %139 = tpu.reciprocal %138 : vector<16x1xf32> -> vector<16x1xf32>
    %140 = vector.broadcast %139 : vector<16x1xf32> to vector<16x16xf32>
    %141 = arith.mulf %136, %140 : vector<16x16xf32>
    %cst_44 = arith.constant dense<0.000000e+00> : vector<16x8xf32>
    %142 = tpu.matmul %141, %128, %cst_44 {dimension_numbers = #tpu.dot_dimension_numbers<[1], [0], [0], [1], [0, 0, 1, 1], [], []>} : vector<16x16xf32>, vector<16x8xf32>, vector<16x8xf32> -> vector<16x8xf32>
    %143 = tpu.concatenate %91, %108, %125, %142 in 1 : vector<16x8xf32>, vector<16x8xf32>, vector<16x8xf32>, vector<16x8xf32> -> vector<16x32xf32>
    %144 = tpu.concatenate %74, %143 in 0 : vector<16x32xf32>, vector<16x32xf32> -> vector<32x32xf32>
    %c0_45 = arith.constant 0 : index
    %c0_46 = arith.constant 0 : index
    %145 = vector.load %arg3[%c0_45, %c0_46] : memref<32x32xf32, #tpu.memory_space<vmem>>, vector<32x32xf32>
    %cst_47 = arith.constant dense<0.000000e+00> : vector<32x32xf32>
    %146 = tpu.matmul %144, %145, %cst_47 {dimension_numbers = #tpu.dot_dimension_numbers<[1], [0], [0], [1], [0, 0, 1, 1], [], []>} : vector<32x32xf32>, vector<32x32xf32>, vector<32x32xf32> -> vector<32x32xf32>
    %c0_48 = arith.constant 0 : index
    %c0_49 = arith.constant 0 : index
    %147 = vector.load %arg4[%c0_48, %c0_49] : memref<1x32xf32, #tpu.memory_space<vmem>>, vector<1x32xf32>
    %148 = vector.broadcast %147 : vector<1x32xf32> to vector<32x32xf32>
    %149 = arith.addf %146, %148 : vector<32x32xf32>
    %c0_50 = arith.constant 0 : index
    %c0_51 = arith.constant 0 : index
    %150 = vector.load %arg5[%c0_50, %c0_51] : memref<32x32xf32, #tpu.memory_space<vmem>>, vector<32x32xf32>
    tpu.vector_store %arg5[%c0_50, %c0_51], %149 {strides = array<i32>} : memref<32x32xf32, #tpu.memory_space<vmem>>, vector<32x32xf32>,
    %151 = tpu.concatenate %21, %38, %55, %72, %90, %107, %124, %141 in 1 : vector<16x16xf32>, vector<16x16xf32>, vector<16x16xf32>, vector<16x16xf32>, vector<16x16xf32>, vector<16x16xf32>, vector<16x16xf32>, vector<16x16xf32> -> vector<16x128xf32>
    %c0_52 = arith.constant 0 : index
    %c0_53 = arith.constant 0 : index
    %152 = vector.load %arg6[%c0_52, %c0_53] : memref<16x128xf32, #tpu.memory_space<vmem>>, vector<16x128xf32>
    tpu.vector_store %arg6[%c0_52, %c0_53], %151 {strides = array<i32>} : memref<16x128xf32, #tpu.memory_space<vmem>>, vector<16x128xf32>,
    return
  }
}

</mosaic_0001>

<bundles_post_ra>
// kernel: tpu_custom_call.1
= control target key start
LH: loop header
LB: loop body
LE: loop exit
PB: predicated region body
PF: predicated region fallthrough
CT: control target
= control target key end

     0   :  { %12 = vsyncpa [#allocation3], 0  ;;  %s3207_s0 = inlined_call_operand.hbm [shape: f32[32,32], index: 0, kind: input, shape index: {}]   ;;  %s3208_s1 = inlined_call_operand.hbm [shape: f32[32,96], index: 1, kind: input, shape index: {}]   ;;  %s3209_s2 = inlined_call_operand.vmem [shape: f32[1,96], index: 2, kind: input, shape index: {}]   ;;  %s3210_s3 = inlined_call_operand.hbm [shape: f32[32,32], index: 3, kind: input, shape index: {}]   ;;  %s3211_s4 = inlined_call_operand.vmem [shape: f32[1,32], index: 4, kind: input, shape index: {}]   ;;  %s3212_s5 = inlined_call_operand.hbm [shape: f32[32,32], index: 5, kind: output, shape index: {0}]   ;;  %s3213_s6 = inlined_call_operand.hbm [shape: f32[16,128], index: 6, kind: output, shape index: {1}]  }
   0x1   :  { %13 = vsyncpa [#allocation6], 0 }
   0x2   :  { %14 = vsyncpa [#allocation4], 0 }
   0x3   :  { %15 = vsyncpa [#allocation10], 0  ;;  %s2719_s21 = smov [#allocation5]   ;;  %s2720_s23 = smov [#allocation2]  }
   0x4   :  { %s33_s22 = sshll.u32 %s2719_s21, 4  ;;  %s21_s24 = sshll.u32 %s2720_s23, 4  ;;  %s34_s22 = int_to_ptr.vmem [resolvable:$true] %s33_s22  ;;  %s2775_s24 = int_to_ptr.vmem [resolvable:$true] %s21_s24 }
   0x5   :  { %s2601_s27 = scalar_lea.hbm %s3208_s1, 512 }
   0x6   :  { %p2602_p0 = scmp.ne.s32.totalorder %s3208_s1, %s2601_s27  ;;  %p2605_p1 = scmp.lt.u32.totalorder %s2601_s27, %s3208_s1 }
   0x8   :  { %p2607_p2 = pnand %p2605_p1, %p2602_p0 }
   0xa   :  { %2610 = shalt.err (!%p2607_p2)
}
   0xb   :  { %s2611_s8 = scalar_lea.vmem %s34_s22, 512  ;;  %p2616_p4 = scmp.lt.s32.totalorder %s34_s22, %s34_s22 }
   0xc   :  { %p2612_p3 = scmp.ne.s32.totalorder %s34_s22, %s2611_s8  ;;  %p2617_p5 = scmp.lt.s32.totalorder %s2611_s8, %s2611_s8 }
   0xe   :  { %p2618_p6 = por %p2617_p5, %p2616_p4 }
  0x10   :  { %p2619_p7 = pnand %p2618_p6, %p2612_p3 }
  0x12   :  { %2622 = shalt.err (!%p2619_p7)
}
  0x13   :  { %s2721_s9 = smov 128   ;;  %s2722_s10 = smov 8  }
  0x14   :  { %39 = dma.hbm_to_vmem [thread:$0]  %s3208_s1, 512, %s34_s22, [#allocation6], %s2721_s9, %s2721_s9, %s2722_s10  }
  0x15   :  { %s2623_s15 = scalar_lea.hbm %s3207_s0, 512 }
  0x16   :  { %p2624_p8 = scmp.ne.s32.totalorder %s3207_s0, %s2623_s15  ;;  %p2627_p9 = scmp.lt.u32.totalorder %s2623_s15, %s3207_s0 }
  0x18   :  { %p2629_p10 = pnand %p2627_p9, %p2624_p8 }
  0x1a   :  { %2632 = shalt.err (!%p2629_p10)
}
  0x1b   :  { %s2633_s20 = scalar_lea.vmem %s2775_s24, 512  ;;  %p2638_p12 = scmp.lt.s32.totalorder %s2775_s24, %s2775_s24 }
  0x1c   :  { %p2634_p11 = scmp.ne.s32.totalorder %s2775_s24, %s2633_s20  ;;  %p2639_p13 = scmp.lt.s32.totalorder %s2633_s20, %s2633_s20 }
  0x1e   :  { %p2640_p0 = por %p2639_p13, %p2638_p12 }
  0x20   :  { %p2641_p1 = pnand %p2640_p0, %p2634_p11 }
  0x22   :  { %2644 = shalt.err (!%p2641_p1)
}
  0x23   :  { %27 = dma.hbm_to_vmem [thread:$0]  %s3207_s0, 512, %s2775_s24, [#allocation3], %s2721_s9, %s2721_s9, %s2722_s10  }
  0x24   :  { %s2723_s22 = smov [#allocation7]   ;;  %s2645_s27 = scalar_lea.hbm %s3210_s3, 512 }
  0x25   :  { %s47_s23 = sshll.u32 %s2723_s22, 4  ;;  %p2646_p2 = scmp.ne.s32.totalorder %s3210_s3, %s2645_s27  ;;  %s48_s23 = int_to_ptr.vmem [resolvable:$true] %s47_s23 }
  0x26   :  { %p2649_p3 = scmp.lt.u32.totalorder %s2645_s27, %s3210_s3 }
  0x28   :  { %p2651_p4 = pnand %p2649_p3, %p2646_p2 }
  0x2a   :  { %2654 = shalt.err (!%p2651_p4)
}
  0x2b   :  { %s2655_s8 = scalar_lea.vmem %s48_s23, 512  ;;  %p2660_p6 = scmp.lt.s32.totalorder %s48_s23, %s48_s23 }
  0x2c   :  { %p2656_p5 = scmp.ne.s32.totalorder %s48_s23, %s2655_s8  ;;  %p2661_p7 = scmp.lt.s32.totalorder %s2655_s8, %s2655_s8 }
  0x2e   :  { %p2662_p8 = por %p2661_p7, %p2660_p6 }
  0x30   :  { %p2663_p9 = pnand %p2662_p8, %p2656_p5 }
  0x32   :  { %2666 = shalt.err (!%p2663_p9)
}
  0x33   :  { %53 = dma.hbm_to_vmem [thread:$0]  %s3210_s3, 512, %s48_s23, [#allocation6], %s2721_s9, %s2721_s9, %s2722_s10  }
  0x34   :  { %2711 = dma.done.wait [#allocation3], 512  }
  0x35   :  { %2712 = vsyncadd [#allocation3], 4294966784 }
  0x36   :  { %2713 = dma.done.wait [#allocation6], 1024  }
  0x37   :  { %2714 = vsyncadd [#allocation6], 4294966272  ;;  %vm80_vm0 = vcmask 261120   ;;  %v69_v0 = vld [vmem:[#allocation5] sm:$0xff]  ;;  %v70_v1 = vld [vmem:[#allocation5 + $0x8] sm:$0xff]  ;;  %vm184_vm1 = vcmask 64512  }
  0x38   :  { %v71_v2 = vld [vmem:[#allocation5 + $0x10] sm:$0xff]  ;;  %v2340_v3 = vpack.c.bf16 %v70_v1, %v69_v0  ;;  %v72_v4 = vld [vmem:[#allocation5 + $0x18] sm:$0xff]  ;;  %v65_v5 = vld [vmem:[#allocation2] sm:$0xff]  ;;  %s2724_s12 = smov 120   ;;  %s2726_s13 = smov 80   ;;  %vm270_vm3 = vcmask 130048  }
  0x39   :  { %v2344_v6 = vpack.c.bf16 %v72_v4, %v71_v2  ;;  %2208 = vmatprep.mubr.msk.f32.mxu1 %vm80_vm0, %v65_v5  ;;  %v66_v7 = vld [vmem:[#allocation2 + $0x8] sm:$0xff]  ;;  %v67_v8 = vld [vmem:[#allocation2 + $0x10] sm:$0xff]  ;;  %v68_v9 = vld [vmem:[#allocation2 + $0x18] sm:$0xff]  ;;  %s2727_s14 = smov 88   ;;  %s2728_s15 = smov 112   ;;  %vm1014_vm4 = vcmask 195584  }
  0x3a   :  { %2341 = vmatprep.subr.bf16.mxu1 %v2340_v3  ;;  %v2834_v10 = vld [vmem:[%s3209_s2] ss:$0 sm:$0xff]  ;;  %s2725_s2 = smov 96   ;;  %vm2869_vm2 = vmpackc.low %vm184_vm1, %vm184_vm1  ;;  %s2729_s16 = smov 56   ;;  %vm2011_vm5 = vcmask 392192   ;;  %vm2014_vm6 = vcmask 523264  }
  0x3b   :  { %2343 = vmatpush3.bf16.msra.mxu1 %v2340_v3  ;;  %s2730_s17 = smov 64   ;;  %s2731_s18 = smov 48   ;;  %vm2017_vm7 = vcmask 654336   ;;  %vm2020_vm8 = vcmask 785408   ;;  %vm2023_vm9 = vcmask 916480  }
  0x3c   :  { %2345 = vmatprep.subr.bf16.mxu1 %v2344_v6  ;;  %s2732_s19 = smov 72   ;;  %s2733_s20 = smov 104  }
  0x3d   :  { %s2734_s1 = smov 40   ;;  %s2735_s21 = smov 16  }
  0x3e   :  { %s2736_s22 = smov 24   ;;  %s2737_s26 = smov 32  }
  0x3f   :  { %2347 = vmatpush3.bf16.msra.mxu1 %v2344_v6 }
  0x42   :  { %2209 = vmatmul.mubr.msk.f32.vlgmr.msra.gmra.mrb[0].mxu1 %vm80_vm0, %v66_v7 }
  0x43   :  { %2211 = vmatprep.mubr.msk.f32.mxu1 %vm80_vm0, %v67_v8 }
  0x46   :  { %2212 = vmatmul.mubr.msk.f32.gmra.mrb[2].mxu1 %vm80_vm0, %v68_v9 }
 0x115   :  { %v2210_v11 = vpop.f32.mrb[0].mxu1 }
 0x116   :  { %v2837_v12 = vadd.f32 %v2210_v11, %v2834_v10  ;;  %v159_v13 = vpop.f32.mrb[1].mxu1 }
 0x117   :  { %v2840_v14 = vadd.f32 %v2834_v10, %v159_v13 }
 0x119   :  { %380 = vrot.lane.b32.xlu1 %v2840_v14, %s2724_s12  ;;  %2218 = vmatprep.mubr.msk.f32.mxu1 %vm184_vm1, %v2840_v14  ;;  %v2848_v15 = vpack.i.bf16 %v2837_v12, %v2840_v14  ;;  %v2862_v16 = vpop.f32.mrb[2].mxu1 }
 0x11a   :  { %v2864_v17 = vpop.f32.mrb[3].mxu1 }
 0x11b   :  { %2458 = vrot.lane.b32.xlu0 %v2848_v15, %s2725_s2 }
 0x11d   :  { %2468 = vrot.lane.b32.xlu1 %v2848_v15, %s2726_s13 }
 0x11f   :  { %2463 = vrot.lane.b32.xlu0 %v2848_v15, %s2727_s14 }
 0x121   :  { %582 = vrot.lane.b32.xlu1 %v2840_v14, %s2728_s15 }
 0x123   :  { %382 = vrot.lane.b32.xlu0 %v2837_v12, %s2724_s12 }
 0x127   :  { %584 = vrot.lane.b32.xlu0 %v2837_v12, %s2728_s15 }
 0x18b   :  { %v381_v18 = vpop.permute.xlu1 %380 }
 0x18c   :  { %2232 = vmatprep.mubr.msk.f32.mxu0 %vm184_vm1, %v381_v18 }
 0x18d   :  { %v2459_v19 = vpop.permute.xlu0 %2458 }
 0x18e   :  { %v2461_v20 = vunpack.i.h.bf16 %v2459_v19  ;;  %v2460_v21 = vunpack.i.l.bf16 %v2459_v19 }
 0x18f   :  { %v2469_v22 = vpop.permute.xlu1 %2468 }
 0x190   :  { %v2348_v24 = vpack.c.bf16 %v2461_v20, %v2460_v21  ;;  %v2471_v26 = vunpack.i.h.bf16 %v2469_v22  ;;  %v2470_v27 = vunpack.i.l.bf16 %v2469_v22 }
 0x191   :  { %v2464_v25 = vpop.permute.xlu0 %2463 }
 0x192   :  { %v2466_v28 = vunpack.i.h.bf16 %v2464_v25  ;;  %v2465_v29 = vunpack.i.l.bf16 %v2464_v25  ;;  %2350 = vmatprep.subr.msk.bf16.mxu1 %vm2869_vm2, %v2348_v24  ;;  %v2368_v31 = vpack.c.bf16 %v2471_v26, %v2470_v27 }
 0x193   :  { %2353 = vmatpush3.bf16.xpose.msk.msra.mxu1 %vm2869_vm2, %v2348_v24  ;;  %v583_v33 = vpop.permute.xlu1 %582 }
 0x194   :  { %v2358_v30 = vpack.c.bf16 %v2466_v28, %v2465_v29 }
 0x195   :  { %v383_v32 = vpop.permute.xlu0 %382 }
 0x196   :  { %2360 = vmatprep.subr.msk.bf16.mxu0 %vm2869_vm2, %v2358_v30 }
 0x197   :  { %2363 = vmatpush3.bf16.xpose.msk.msra.mxu0 %vm2869_vm2, %v2358_v30 }
 0x198   :  { %2370 = vmatprep.subr.msk.bf16.mxu0 %vm2869_vm2, %v2368_v31 }
 0x199   :  { %v585_v34 = vpop.permute.xlu0 %584 }
 0x19a   :  { %2219 = vmatmul.mubr.msk.f32.vlgmr.msra.gmra.mrb[4].mxu1 %vm184_vm1, %v2837_v12 }
 0x19e   :  { %2233 = vmatmul.mubr.msk.f32.vlgmr.msra.gmra.mrb[0].mxu0 %vm184_vm1, %v383_v32 }
 0x19f   :  { %2373 = vmatpush3.bf16.xpose.msk.msra.mxu0 %vm2869_vm2, %v2368_v31  ;;  %2246 = vmatprep.mubr.msk.f32.mxu0 %vm184_vm1, %v583_v33 }
 0x1a6   :  { %2247 = vmatmul.mubr.msk.f32.vlgmr.msra.gmra.mrb[2].mxu0 %vm184_vm1, %v585_v34 }
 0x26d   :  { %v2220_v35 = vpop.f32.mrb[4].mxu1 }
 0x26e   :  { %v269_v36 = vmul.f32 0.35355338, %v2220_v35  ;;  %v259_v37 = vpop.f32.mrb[5].mxu1 }
 0x26f   :  { %v268_v38 = vmul.f32 0.35355338, %v259_v37 }
 0x270   :  { %v274_v39 = vsel %vm270_vm3, %v269_v36, -inf }
 0x271   :  { %v2234_v40 = vpop.f32.mrb[0].mxu0  ;;  %275 = vmax.xlane.f32.xlu0 %v274_v39  ;;  %v271_v41 = vsel %vm270_vm3, %v268_v38, -inf }
 0x272   :  { %v472_v42 = vmul.f32 0.35355338, %v2234_v40  ;;  %v462_v43 = vpop.f32.mrb[1].mxu0  ;;  %272 = vmax.xlane.f32.xlu1 %v271_v41 }
 0x273   :  { %v471_v44 = vmul.f32 0.35355338, %v462_v43 }
 0x274   :  { %v476_v45 = vsel %vm270_vm3, %v472_v42, -inf }
 0x275   :  { %v473_v46 = vsel %vm270_vm3, %v471_v44, -inf }
 0x276   :  { %474 = vmax.xlane.f32.xlu0 %v473_v46  ;;  %477 = vmax.xlane.f32.xlu1 %v476_v45 }
 0x279   :  { %v2248_v47 = vpop.f32.mrb[2].mxu0 }
 0x27a   :  { %v2894_v48 = vmul.f32 0.35355338, %v2248_v47  ;;  %v664_v49 = vpop.f32.mrb[3].mxu0 }
 0x27b   :  { %v673_v50 = vmul.f32 0.35355338, %v664_v49 }
 0x27c   :  { %v678_v51 = vsel %vm270_vm3, %v2894_v48, -inf }
 0x27d   :  { %679 = vmax.xlane.f32.xlu1 %v678_v51  ;;  %v675_v52 = vsel %vm270_vm3, %v673_v50, -inf }
 0x27e   :  { %676 = vmax.xlane.f32.xlu0 %v675_v52 }
 0x28e   :  { %2478 = vrot.lane.b32.xlu1 %v2848_v15, %s2729_s16 }
 0x294   :  { %2473 = vrot.lane.b32.xlu0 %v2848_v15, %s2730_s17 }
 0x2fe   :  { %v276_v53 = vpop.xlane.xlu0 %275 }
 0x2ff   :  { %v278_v54 = vsub.f32 %v269_v36, %v276_v53  ;;  %v273_v55 = vpop.xlane.xlu1 %272 }
 0x300   :  { %v277_v56 = vsub.f32 %v268_v38, %v273_v55 }
 0x301   :  { %v281_v57 = vmul.f32 1.442695, %v278_v54 }
 0x302   :  { %v279_v58 = vmul.f32 1.442695, %v277_v56 }
 0x303   :  { %2537 = vpow2.f32 %v281_v57  ;;  %v475_v59 = vpop.xlane.xlu0 %474  ;;  %v478_v60 = vpop.xlane.xlu1 %477 }
 0x304   :  { %2539 = vpow2.f32 %v279_v58  ;;  %v479_v61 = vsub.f32 %v471_v44, %v475_v59  ;;  %v480_v62 = vsub.f32 %v472_v42, %v478_v60 }
 0x306   :  { %v481_v63 = vmul.f32 1.442695, %v479_v61  ;;  %v483_v0 = vmul.f32 1.442695, %v480_v62 }
 0x308   :  { %2541 = vpow2.f32 %v481_v63 }
 0x309   :  { %2543 = vpow2.f32 %v483_v0 }
 0x30a   :  { %v680_v1 = vpop.xlane.xlu1 %679 }
 0x30b   :  { %v677_v2 = vpop.xlane.xlu0 %676  ;;  %v682_v30 = vsub.f32 %v2894_v48, %v680_v1 }
 0x30c   :  { %v681_v3 = vsub.f32 %v673_v50, %v677_v2 }
 0x30d   :  { %v2538_v4 = vpop.eup %2537  ;;  %v685_v31 = vmul.f32 1.442695, %v682_v30 }
 0x30e   :  { %v2540_v5 = vpop.eup %2539  ;;  %v683_v6 = vmul.f32 1.442695, %v681_v3  ;;  %v2479_v7 = vpop.permute.xlu1 %2478  ;;  %v286_v8 = vsel %vm270_vm3, %v2538_v4, 0.0 }
 0x30f   :  { %v2481_v9 = vunpack.i.h.bf16 %v2479_v7  ;;  %v2474_v11 = vpop.permute.xlu0 %2473  ;;  %287 = vadd.xlane.f32.xlu1 %v286_v8  ;;  %v283_v13 = vsel %vm270_vm3, %v2540_v5, 0.0  ;;  %v2480_v18 = vunpack.i.l.bf16 %v2479_v7 }
 0x310   :  { %2545 = vpow2.f32 %v683_v6  ;;  %v2476_v19 = vunpack.i.h.bf16 %v2474_v11  ;;  %v2475_v20 = vunpack.i.l.bf16 %v2474_v11  ;;  %284 = vadd.xlane.f32.xlu0 %v283_v13 }
 0x311   :  { %v2364_v26 = vpack.c.bf16 %v2481_v9, %v2480_v18  ;;  %2547 = vpow2.f32 %v685_v31 }
 0x312   :  { %v2542_v21 = vpop.eup %2541  ;;  %v2354_v22 = vpack.c.bf16 %v2476_v19, %v2475_v20 }
 0x313   :  { %v2544_v24 = vpop.eup %2543  ;;  %v485_v25 = vsel %vm270_vm3, %v2542_v21, 0.0 }
 0x314   :  { %2355 = vmatprep.subr.bf16.mxu1 %v2354_v22  ;;  %486 = vadd.xlane.f32.xlu0 %v485_v25  ;;  %v488_v27 = vsel %vm270_vm3, %v2544_v24, 0.0  ;;  %v2966_v25 = vadd.f32 %v2862_v16, %v2834_v10 }
 0x315   :  { %489 = vadd.xlane.f32.xlu1 %v488_v27  ;;  %2357 = vmatpush3.bf16.msra.mxu1 %v2354_v22 }
 0x316   :  { %2365 = vmatprep.subr.bf16.mxu1 %v2364_v26 }
 0x31a   :  { %v2546_v28 = vpop.eup %2545 }
 0x31b   :  { %v687_v29 = vsel %vm270_vm3, %v2546_v28, 0.0  ;;  %v2548_v32 = vpop.eup %2547 }
 0x31c   :  { %688 = vadd.xlane.f32.xlu0 %v687_v29  ;;  %v690_v33 = vsel %vm270_vm3, %v2548_v32, 0.0 }
 0x326   :  { %2483 = vrot.lane.b32.xlu1 %v2848_v15, %s2731_s18 }
 0x332   :  { %2488 = vrot.lane.b32.xlu0 %v2848_v15, %s2732_s19 }
 0x336   :  { %786 = vrot.lane.b32.xlu0 %v2837_v12, %s2733_s20 }
 0x34a   :  { %691 = vadd.xlane.f32.xlu1 %v690_v33 }
 0x35b   :  { %784 = vrot.lane.b32.xlu1 %v2840_v14, %s2733_s20 }
 0x39c   :  { %v288_v34 = vpop.xlane.xlu1 %287 }
 0x39d   :  { %2549 = vrcp.f32 %v288_v34  ;;  %v285_v35 = vpop.xlane.xlu0 %284 }
 0x39e   :  { %2551 = vrcp.f32 %v285_v35 }
 0x3a1   :  { %v487_v36 = vpop.xlane.xlu0 %486 }
 0x3a2   :  { %2553 = vrcp.f32 %v487_v36  ;;  %v490_v37 = vpop.xlane.xlu1 %489 }
 0x3a3   :  { %2555 = vrcp.f32 %v490_v37 }
 0x3a6   :  { %v2484_v38 = vpop.permute.xlu1 %2483 }
 0x3a7   :  { %v2550_v39 = vpop.eup %2549  ;;  %v2486_v40 = vunpack.i.h.bf16 %v2484_v38  ;;  %v2485_v41 = vunpack.i.l.bf16 %v2484_v38 }
 0x3a8   :  { %v2552_v12 = vpop.eup %2551  ;;  %v2920_v44 = vmul.f32 %v2550_v39, %v2538_v4 }
 0x3a9   :  { %v689_v42 = vpop.xlane.xlu0 %688  ;;  %v2918_v43 = vmul.f32 %v2552_v12, %v2540_v5  ;;  %v2374_v45 = vpack.c.bf16 %v2486_v40, %v2485_v41 }
 0x3aa   :  { %2557 = vrcp.f32 %v689_v42 }
 0x3ab   :  { %2225 = vmatprep.mubr.msk.f32.mxu1 %vm270_vm3, %v2918_v43 }
 0x3ac   :  { %v2554_v14 = vpop.eup %2553  ;;  %2226 = vmatmul.mubr.msk.f32.vlgmr.msra.gmra.mrb[6].mxu1 %vm270_vm3, %v2920_v44 }
 0x3ad   :  { %v2556_v46 = vpop.eup %2555  ;;  %2367 = vmatpush3.bf16.msra.mxu1 %v2364_v26  ;;  %v2489_v47 = vpop.permute.xlu0 %2488  ;;  %v2926_v48 = vmul.f32 %v2554_v14, %v2542_v21  ;;  %v2970_v26 = vadd.f32 %v2834_v10, %v2864_v17 }
 0x3ae   :  { %v2928_v49 = vmul.f32 %v2556_v46, %v2544_v24  ;;  %v2491_v50 = vunpack.i.h.bf16 %v2489_v47  ;;  %v2490_v51 = vunpack.i.l.bf16 %v2489_v47  ;;  %2375 = vmatprep.subr.bf16.mxu1 %v2374_v45 }
 0x3af   :  { %2239 = vmatprep.mubr.msk.f32.mxu1 %vm270_vm3, %v2926_v48  ;;  %v2974_v27 = vpack.i.bf16 %v2966_v25, %v2970_v26 }
 0x3b0   :  { %v2378_v52 = vpack.c.bf16 %v2491_v50, %v2490_v51  ;;  %2240 = vmatmul.mubr.msk.f32.vlgmr.msra.gmra.mrb[8].mxu1 %vm270_vm3, %v2928_v49 }
 0x3b1   :  { %2377 = vmatpush3.bf16.msra.mxu1 %v2374_v45  ;;  %v787_v59 = vpop.permute.xlu0 %786 }
 0x3b2   :  { %2380 = vmatprep.subr.msk.bf16.mxu1 %vm2869_vm2, %v2378_v52 }
 0x3b4   :  { %v2558_v53 = vpop.eup %2557 }
 0x3b5   :  { %v2936_v54 = vmul.f32 %v2558_v53, %v2546_v28 }
 0x3b7   :  { %2253 = vmatprep.mubr.msk.f32.mxu1 %vm270_vm3, %v2936_v54 }
 0x3d7   :  { %v692_v55 = vpop.xlane.xlu1 %691 }
 0x3d8   :  { %2559 = vrcp.f32 %v692_v55 }
 0x3db   :  { %v785_v58 = vpop.permute.xlu1 %784 }
 0x3e2   :  { %v2560_v56 = vpop.eup %2559 }
 0x3e3   :  { %v2940_v57 = vmul.f32 %v2560_v56, %v2548_v32 }
 0x3e5   :  { %2254 = vmatmul.mubr.msk.f32.vlgmr.msra.gmra.mrb[10].mxu1 %vm270_vm3, %v2940_v57 }
 0x3e6   :  { %2383 = vmatpush3.bf16.xpose.msk.msra.mxu1 %vm2869_vm2, %v2378_v52  ;;  %2260 = vmatprep.mubr.msk.f32.mxu1 %vm184_vm1, %v785_v58 }
 0x3ed   :  { %2261 = vmatmul.mubr.msk.f32.vlgmr.msra.gmra.mrb[12].mxu1 %vm184_vm1, %v787_v59 }
 0x47f   :  { %v2948_v60 = vpop.f32.mrb[6].mxu1 }
 0x480   :  { %v2950_v61 = vpop.f32.mrb[7].mxu1 }
 0x483   :  { %v2952_v62 = vpop.f32.mrb[8].mxu1 }
 0x484   :  { %v2954_v63 = vpop.f32.mrb[9].mxu1 }
 0x4b8   :  { %v2956_v0 = vpop.f32.mrb[10].mxu1 }
 0x4b9   :  { %v2958_v1 = vpop.f32.mrb[11].mxu1 }
 0x4c0   :  { %v2262_v2 = vpop.f32.mrb[12].mxu1 }
 0x4c1   :  { %v876_v3 = vmul.f32 0.35355338, %v2262_v2  ;;  %v866_v4 = vpop.f32.mrb[13].mxu1 }
 0x4c2   :  { %v875_v5 = vmul.f32 0.35355338, %v866_v4 }
 0x4c3   :  { %v880_v6 = vsel %vm270_vm3, %v876_v3, -inf }
 0x4c4   :  { %881 = vmax.xlane.f32.xlu0 %v880_v6  ;;  %v877_v7 = vsel %vm270_vm3, %v875_v5, -inf }
 0x4c5   :  { %878 = vmax.xlane.f32.xlu1 %v877_v7 }
 0x551   :  { %v882_v8 = vpop.xlane.xlu0 %881 }
 0x552   :  { %v884_v9 = vsub.f32 %v876_v3, %v882_v8  ;;  %v879_v11 = vpop.xlane.xlu1 %878 }
 0x553   :  { %v883_v13 = vsub.f32 %v875_v5, %v879_v11 }
 0x554   :  { %v887_v18 = vmul.f32 1.442695, %v884_v9 }
 0x555   :  { %v885_v19 = vmul.f32 1.442695, %v883_v13 }
 0x556   :  { %2561 = vpow2.f32 %v887_v18 }
 0x557   :  { %2563 = vpow2.f32 %v885_v19 }
 0x560   :  { %v2562_v20 = vpop.eup %2561 }
 0x561   :  { %v2564_v21 = vpop.eup %2563  ;;  %v892_v22 = vsel %vm270_vm3, %v2562_v20, 0.0 }
 0x562   :  { %893 = vadd.xlane.f32.xlu1 %v892_v22  ;;  %v889_v24 = vsel %vm270_vm3, %v2564_v21, 0.0 }
 0x563   :  { %890 = vadd.xlane.f32.xlu0 %v889_v24 }
 0x573   :  { %2498 = vrot.lane.b32.xlu1 %v2974_v27, %s2725_s2 }
 0x579   :  { %2493 = vrot.lane.b32.xlu0 %v2848_v15, %s2734_s1 }
 0x5ef   :  { %v894_v28 = vpop.xlane.xlu1 %893 }
 0x5f0   :  { %2565 = vrcp.f32 %v894_v28  ;;  %v891_v29 = vpop.xlane.xlu0 %890 }
 0x5f1   :  { %2567 = vrcp.f32 %v891_v29 }
 0x5f3   :  { %v2499_v16 = vpop.permute.xlu1 %2498 }
 0x5f4   :  { %v2494_v30 = vpop.permute.xlu0 %2493  ;;  %v2501_v31 = vunpack.i.h.bf16 %v2499_v16  ;;  %v2500_v10 = vunpack.i.l.bf16 %v2499_v16 }
 0x5f5   :  { %v2496_v17 = vunpack.i.h.bf16 %v2494_v30  ;;  %v2495_v32 = vunpack.i.l.bf16 %v2494_v30 }
 0x5f6   :  { %v2388_v34 = vpack.c.bf16 %v2501_v31, %v2500_v10 }
 0x5f7   :  { %v2384_v33 = vpack.c.bf16 %v2496_v17, %v2495_v32 }
 0x5f9   :  { %2385 = vmatprep.subr.bf16.mxu0 %v2384_v33 }
 0x5fa   :  { %v2566_v35 = vpop.eup %2565  ;;  %2387 = vmatpush3.bf16.msra.mxu0 %v2384_v33 }
 0x5fb   :  { %v2568_v36 = vpop.eup %2567  ;;  %2390 = vmatprep.subr.msk.bf16.mxu0 %vm2869_vm2, %v2388_v34  ;;  %v2984_v37 = vmul.f32 %v2566_v35, %v2562_v20 }
 0x5fc   :  { %v2982_v15 = vmul.f32 %v2568_v36, %v2564_v21 }
 0x5fe   :  { %2267 = vmatprep.mubr.msk.f32.mxu0 %vm270_vm3, %v2982_v15 }
 0x5ff   :  { %2268 = vmatmul.mubr.msk.f32.vlgmr.msra.gmra.mrb[4].mxu0 %vm270_vm3, %v2984_v37 }
 0x600   :  { %2274 = vmatprep.mubr.msk.f32.mxu0 %vm184_vm1, %v2970_v26 }
 0x603   :  { %2393 = vmatpush3.bf16.xpose.msk.msra.mxu0 %vm2869_vm2, %v2388_v34 }
 0x60a   :  { %2275 = vmatmul.mubr.msk.f32.vlgmr.msra.gmra.mrb[6].mxu0 %vm184_vm1, %v2966_v25 }
 0x6d2   :  { %v2996_v38 = vpop.f32.mrb[4].mxu0 }
 0x6d3   :  { %v2998_v39 = vpop.f32.mrb[5].mxu0 }
 0x6dd   :  { %v2276_v12 = vpop.f32.mrb[6].mxu0 }
 0x6de   :  { %v1107_v40 = vmul.f32 0.35355338, %v2276_v12  ;;  %v1097_v41 = vpop.f32.mrb[7].mxu0 }
 0x6df   :  { %v1106_v42 = vmul.f32 0.35355338, %v1097_v41 }
 0x6e0   :  { %v1111_v14 = vsel %vm270_vm3, %v1107_v40, -inf }
 0x6e1   :  { %1112 = vmax.xlane.f32.xlu0 %v1111_v14  ;;  %v1108_v45 = vsel %vm270_vm3, %v1106_v42, -inf }
 0x6e2   :  { %1109 = vmax.xlane.f32.xlu1 %v1108_v45 }
 0x76e   :  { %v1113_v46 = vpop.xlane.xlu0 %1112 }
 0x76f   :  { %v1115_v47 = vsub.f32 %v1107_v40, %v1113_v46  ;;  %v1110_v50 = vpop.xlane.xlu1 %1109 }
 0x770   :  { %v1114_v51 = vsub.f32 %v1106_v42, %v1110_v50 }
 0x771   :  { %v1118_v52 = vmul.f32 1.442695, %v1115_v47 }
 0x772   :  { %v1116_v53 = vmul.f32 1.442695, %v1114_v51 }
 0x773   :  { %2569 = vpow2.f32 %v1118_v52 }
 0x774   :  { %2571 = vpow2.f32 %v1116_v53 }
 0x77d   :  { %v2570_v55 = vpop.eup %2569 }
 0x77e   :  { %v2572_v56 = vpop.eup %2571  ;;  %v1123_v58 = vsel %vm270_vm3, %v2570_v55, 0.0 }
 0x77f   :  { %1124 = vadd.xlane.f32.xlu1 %v1123_v58  ;;  %v1120_v59 = vsel %vm270_vm3, %v2572_v56, 0.0 }
 0x780   :  { %1121 = vadd.xlane.f32.xlu0 %v1120_v59 }
 0x790   :  { %2508 = vrot.lane.b32.xlu1 %v2974_v27, %s2727_s14 }
 0x794   :  { %1217 = vrot.lane.b32.xlu1 %v2970_v26, %s2724_s12 }
 0x796   :  { %2503 = vrot.lane.b32.xlu0 %v2974_v27, %s2730_s17 }
 0x79a   :  { %1219 = vrot.lane.b32.xlu0 %v2966_v25, %s2724_s12 }
 0x80c   :  { %v1125_v2 = vpop.xlane.xlu1 %1124 }
 0x80d   :  { %2573 = vrcp.f32 %v1125_v2  ;;  %v1122_v3 = vpop.xlane.xlu0 %1121 }
 0x80e   :  { %2575 = vrcp.f32 %v1122_v3 }
 0x810   :  { %v2509_v4 = vpop.permute.xlu1 %2508 }
 0x811   :  { %v2504_v5 = vpop.permute.xlu0 %2503  ;;  %v2511_v6 = vunpack.i.h.bf16 %v2509_v4  ;;  %v2510_v7 = vunpack.i.l.bf16 %v2509_v4 }
 0x812   :  { %v2506_v8 = vunpack.i.h.bf16 %v2504_v5  ;;  %v2505_v9 = vunpack.i.l.bf16 %v2504_v5 }
 0x813   :  { %v2398_v13 = vpack.c.bf16 %v2511_v6, %v2510_v7 }
 0x814   :  { %v2394_v11 = vpack.c.bf16 %v2506_v8, %v2505_v9  ;;  %v1218_v22 = vpop.permute.xlu1 %1217 }
 0x815   :  { %v1220_v24 = vpop.permute.xlu0 %1219 }
 0x816   :  { %2395 = vmatprep.subr.bf16.mxu1 %v2394_v11 }
 0x817   :  { %v2574_v18 = vpop.eup %2573  ;;  %2397 = vmatpush3.bf16.msra.mxu1 %v2394_v11 }
 0x818   :  { %v2576_v19 = vpop.eup %2575  ;;  %2400 = vmatprep.subr.msk.bf16.mxu1 %vm2869_vm2, %v2398_v13  ;;  %v3016_v21 = vmul.f32 %v2574_v18, %v2570_v55 }
 0x819   :  { %v3014_v20 = vmul.f32 %v2576_v19, %v2572_v56 }
 0x81b   :  { %2281 = vmatprep.mubr.msk.f32.mxu1 %vm270_vm3, %v3014_v20 }
 0x81c   :  { %2282 = vmatmul.mubr.msk.f32.vlgmr.msra.gmra.mrb[14].mxu1 %vm270_vm3, %v3016_v21 }
 0x81d   :  { %2288 = vmatprep.mubr.msk.f32.mxu1 %vm184_vm1, %v1218_v22 }
 0x820   :  { %2403 = vmatpush3.bf16.xpose.msk.msra.mxu1 %vm2869_vm2, %v2398_v13 }
 0x827   :  { %2289 = vmatmul.mubr.msk.f32.vlgmr.msra.gmra.mrb[16].mxu1 %vm184_vm1, %v1220_v24 }
 0x8ef   :  { %v3026_v28 = vpop.f32.mrb[14].mxu1 }
 0x8f0   :  { %v3028_v29 = vpop.f32.mrb[15].mxu1 }
 0x8fa   :  { %v2290_v16 = vpop.f32.mrb[16].mxu1 }
 0x8fb   :  { %v1309_v30 = vmul.f32 0.35355338, %v2290_v16  ;;  %v1299_v31 = vpop.f32.mrb[17].mxu1 }
 0x8fc   :  { %v1308_v10 = vmul.f32 0.35355338, %v1299_v31 }
 0x8fd   :  { %v1313_v17 = vsel %vm270_vm3, %v1309_v30, -inf }
 0x8fe   :  { %1314 = vmax.xlane.f32.xlu0 %v1313_v17  ;;  %v1310_v32 = vsel %vm270_vm3, %v1308_v10, -inf }
 0x8ff   :  { %1311 = vmax.xlane.f32.xlu1 %v1310_v32 }
 0x98b   :  { %v1315_v33 = vpop.xlane.xlu0 %1314 }
 0x98c   :  { %v1317_v34 = vsub.f32 %v1309_v30, %v1315_v33  ;;  %v1312_v35 = vpop.xlane.xlu1 %1311 }
 0x98d   :  { %v1316_v36 = vsub.f32 %v1308_v10, %v1312_v35 }
 0x98e   :  { %v1320_v12 = vmul.f32 1.442695, %v1317_v34 }
 0x98f   :  { %v1318_v40 = vmul.f32 1.442695, %v1316_v36 }
 0x990   :  { %2577 = vpow2.f32 %v1320_v12 }
 0x991   :  { %2579 = vpow2.f32 %v1318_v40 }
 0x99a   :  { %v2578_v41 = vpop.eup %2577 }
 0x99b   :  { %v2580_v42 = vpop.eup %2579  ;;  %v1325_v14 = vsel %vm270_vm3, %v2578_v41, 0.0 }
 0x99c   :  { %1326 = vadd.xlane.f32.xlu1 %v1325_v14  ;;  %v1322_v45 = vsel %vm270_vm3, %v2580_v42, 0.0 }
 0x99d   :  { %1323 = vadd.xlane.f32.xlu0 %v1322_v45 }
 0x9ad   :  { %2518 = vrot.lane.b32.xlu1 %v2974_v27, %s2726_s13 }
 0x9b1   :  { %1419 = vrot.lane.b32.xlu1 %v2970_v26, %s2728_s15 }
 0x9b3   :  { %2513 = vrot.lane.b32.xlu0 %v2974_v27, %s2729_s16 }
 0x9b7   :  { %1421 = vrot.lane.b32.xlu0 %v2966_v25, %s2728_s15 }
 0xa29   :  { %v1327_v46 = vpop.xlane.xlu1 %1326 }
 0xa2a   :  { %2581 = vrcp.f32 %v1327_v46  ;;  %v1324_v47 = vpop.xlane.xlu0 %1323 }
 0xa2b   :  { %2583 = vrcp.f32 %v1324_v47 }
 0xa2d   :  { %v2519_v50 = vpop.permute.xlu1 %2518 }
 0xa2e   :  { %v2514_v51 = vpop.permute.xlu0 %2513  ;;  %v2521_v52 = vunpack.i.h.bf16 %v2519_v50  ;;  %v2520_v53 = vunpack.i.l.bf16 %v2519_v50 }
 0xa2f   :  { %v2516_v55 = vunpack.i.h.bf16 %v2514_v51  ;;  %v2515_v56 = vunpack.i.l.bf16 %v2514_v51 }
 0xa30   :  { %v2408_v59 = vpack.c.bf16 %v2521_v52, %v2520_v53 }
 0xa31   :  { %v2404_v58 = vpack.c.bf16 %v2516_v55, %v2515_v56  ;;  %v1420_v6 = vpop.permute.xlu1 %1419 }
 0xa32   :  { %v1422_v7 = vpop.permute.xlu0 %1421 }
 0xa33   :  { %2405 = vmatprep.subr.bf16.mxu0 %v2404_v58 }
 0xa34   :  { %v2582_v2 = vpop.eup %2581  ;;  %2407 = vmatpush3.bf16.msra.mxu0 %v2404_v58 }
 0xa35   :  { %v2584_v3 = vpop.eup %2583  ;;  %2410 = vmatprep.subr.msk.bf16.mxu0 %vm2869_vm2, %v2408_v59  ;;  %v3046_v5 = vmul.f32 %v2582_v2, %v2578_v41 }
 0xa36   :  { %v3044_v4 = vmul.f32 %v2584_v3, %v2580_v42 }
 0xa38   :  { %2295 = vmatprep.mubr.msk.f32.mxu0 %vm270_vm3, %v3044_v4 }
 0xa39   :  { %2296 = vmatmul.mubr.msk.f32.vlgmr.msra.gmra.mrb[8].mxu0 %vm270_vm3, %v3046_v5 }
 0xa3a   :  { %2302 = vmatprep.mubr.msk.f32.mxu0 %vm184_vm1, %v1420_v6 }
 0xa3d   :  { %2413 = vmatpush3.bf16.xpose.msk.msra.mxu0 %vm2869_vm2, %v2408_v59 }
 0xa44   :  { %2303 = vmatmul.mubr.msk.f32.vlgmr.msra.gmra.mrb[10].mxu0 %vm184_vm1, %v1422_v7 }
 0xb0c   :  { %v3056_v8 = vpop.f32.mrb[8].mxu0 }
 0xb0d   :  { %v3058_v9 = vpop.f32.mrb[9].mxu0 }
 0xb17   :  { %v2304_v11 = vpop.f32.mrb[10].mxu0 }
 0xb18   :  { %v1511_v13 = vmul.f32 0.35355338, %v2304_v11  ;;  %v1501_v18 = vpop.f32.mrb[11].mxu0 }
 0xb19   :  { %v1510_v19 = vmul.f32 0.35355338, %v1501_v18 }
 0xb1a   :  { %v1515_v22 = vsel %vm270_vm3, %v1511_v13, -inf }
 0xb1b   :  { %1516 = vmax.xlane.f32.xlu0 %v1515_v22  ;;  %v1512_v24 = vsel %vm270_vm3, %v1510_v19, -inf }
 0xb1c   :  { %1513 = vmax.xlane.f32.xlu1 %v1512_v24 }
 0xba8   :  { %v1517_v16 = vpop.xlane.xlu0 %1516 }
 0xba9   :  { %v1519_v30 = vsub.f32 %v1511_v13, %v1517_v16  ;;  %v1514_v31 = vpop.xlane.xlu1 %1513 }
 0xbaa   :  { %v1518_v10 = vsub.f32 %v1510_v19, %v1514_v31 }
 0xbab   :  { %v1522_v17 = vmul.f32 1.442695, %v1519_v30 }
 0xbac   :  { %v1520_v32 = vmul.f32 1.442695, %v1518_v10 }
 0xbad   :  { %2585 = vpow2.f32 %v1522_v17 }
 0xbae   :  { %2587 = vpow2.f32 %v1520_v32 }
 0xbb7   :  { %v2586_v33 = vpop.eup %2585 }
 0xbb8   :  { %v2588_v34 = vpop.eup %2587  ;;  %v1527_v35 = vsel %vm270_vm3, %v2586_v33, 0.0 }
 0xbb9   :  { %1528 = vadd.xlane.f32.xlu1 %v1527_v35  ;;  %v1524_v36 = vsel %vm270_vm3, %v2588_v34, 0.0 }
 0xbba   :  { %1525 = vadd.xlane.f32.xlu0 %v1524_v36  ;;  %v1855_v36 = vld [vmem:[#allocation7 + $0x10] sm:$0xff] }
 0xbca   :  { %2528 = vrot.lane.b32.xlu1 %v2974_v27, %s2732_s19 }
 0xbce   :  { %1621 = vrot.lane.b32.xlu1 %v2970_v26, %s2733_s20 }
 0xbd0   :  { %2523 = vrot.lane.b32.xlu0 %v2974_v27, %s2731_s18 }
 0xbd4   :  { %1623 = vrot.lane.b32.xlu0 %v2966_v25, %s2733_s20 }
 0xc46   :  { %v1529_v12 = vpop.xlane.xlu1 %1528 }
 0xc47   :  { %2589 = vrcp.f32 %v1529_v12  ;;  %v1526_v40 = vpop.xlane.xlu0 %1525  ;;  %v1856_v12 = vld [vmem:[#allocation7 + $0x18] sm:$0xff] }
 0xc48   :  { %2591 = vrcp.f32 %v1526_v40 }
 0xc4a   :  { %v2529_v41 = vpop.permute.xlu1 %2528 }
 0xc4b   :  { %v2524_v42 = vpop.permute.xlu0 %2523  ;;  %v2531_v14 = vunpack.i.h.bf16 %v2529_v41  ;;  %v2530_v45 = vunpack.i.l.bf16 %v2529_v41 }
 0xc4c   :  { %v2526_v46 = vunpack.i.h.bf16 %v2524_v42  ;;  %v2525_v47 = vunpack.i.l.bf16 %v2524_v42 }
 0xc4d   :  { %v2418_v51 = vpack.c.bf16 %v2531_v14, %v2530_v45 }
 0xc4e   :  { %v2414_v50 = vpack.c.bf16 %v2526_v46, %v2525_v47  ;;  %v1622_v55 = vpop.permute.xlu1 %1621  ;;  %v2432_v47 = vpack.c.bf16 %v1856_v12, %v1855_v36 }
 0xc4f   :  { %v1624_v56 = vpop.permute.xlu0 %1623 }
 0xc50   :  { %2415 = vmatprep.subr.bf16.mxu1 %v2414_v50 }
 0xc51   :  { %v2590_v26 = vpop.eup %2589  ;;  %2417 = vmatpush3.bf16.msra.mxu1 %v2414_v50 }
 0xc52   :  { %v2592_v52 = vpop.eup %2591  ;;  %2420 = vmatprep.subr.msk.bf16.mxu1 %vm2869_vm2, %v2418_v51  ;;  %v3076_v53 = vmul.f32 %v2590_v26, %v2586_v33 }
 0xc53   :  { %v3074_v25 = vmul.f32 %v2592_v52, %v2588_v34 }
 0xc55   :  { %2309 = vmatprep.mubr.msk.f32.mxu1 %vm270_vm3, %v3074_v25 }
 0xc56   :  { %2310 = vmatmul.mubr.msk.f32.vlgmr.msra.gmra.mrb[18].mxu1 %vm270_vm3, %v3076_v53 }
 0xc57   :  { %2316 = vmatprep.mubr.msk.f32.mxu1 %vm184_vm1, %v1622_v55 }
 0xc5a   :  { %2423 = vmatpush3.bf16.xpose.msk.msra.mxu1 %vm2869_vm2, %v2418_v51 }
 0xc61   :  { %2317 = vmatmul.mubr.msk.f32.vlgmr.msra.gmra.mrb[20].mxu1 %vm184_vm1, %v1624_v56 }
 0xd29   :  { %v2311_v58 = vpop.f32.mrb[18].mxu1 }
 0xd2a   :  { %v1612_v59 = vpop.f32.mrb[19].mxu1 }
 0xd34   :  { %v2318_v2 = vpop.f32.mrb[20].mxu1 }
 0xd35   :  { %v1713_v3 = vmul.f32 0.35355338, %v2318_v2  ;;  %v1703_v6 = vpop.f32.mrb[21].mxu1 }
 0xd36   :  { %v1712_v7 = vmul.f32 0.35355338, %v1703_v6 }
 0xd37   :  { %v1717_v11 = vsel %vm270_vm3, %v1713_v3, -inf }
 0xd38   :  { %1718 = vmax.xlane.f32.xlu0 %v1717_v11  ;;  %v1714_v13 = vsel %vm270_vm3, %v1712_v7, -inf }
 0xd39   :  { %1715 = vmax.xlane.f32.xlu1 %v1714_v13 }
 0xdc5   :  { %v1719_v18 = vpop.xlane.xlu0 %1718 }
 0xdc6   :  { %v1721_v19 = vsub.f32 %v1713_v3, %v1719_v18  ;;  %v1716_v22 = vpop.xlane.xlu1 %1715 }
 0xdc7   :  { %v1720_v23 = vsub.f32 %v1712_v7, %v1716_v22 }
 0xdc8   :  { %v1724_v24 = vmul.f32 1.442695, %v1721_v19 }
 0xdc9   :  { %v1722_v16 = vmul.f32 1.442695, %v1720_v23 }
 0xdca   :  { %2593 = vpow2.f32 %v1724_v24 }
 0xdcb   :  { %2595 = vpow2.f32 %v1722_v16 }
 0xdd4   :  { %v2594_v30 = vpop.eup %2593 }
 0xdd5   :  { %v2596_v31 = vpop.eup %2595  ;;  %v1729_v10 = vsel %vm270_vm3, %v2594_v30, 0.0 }
 0xdd6   :  { %1730 = vadd.xlane.f32.xlu1 %v1729_v10  ;;  %v1726_v17 = vsel %vm270_vm3, %v2596_v31, 0.0 }
 0xdd7   :  { %1727 = vadd.xlane.f32.xlu0 %v1726_v17 }
 0xde7   :  { %988 = vrot.lane.b32.xlu1 %v2954_v63, %s2722_s10 }
 0xdeb   :  { %990 = vrot.lane.b32.xlu1 %v2952_v62, %s2722_s10 }
 0xded   :  { %2533 = vrot.lane.b32.xlu0 %v2974_v27, %s2734_s1  ;;  %v1853_v27 = vld [vmem:[#allocation7] sm:$0xff] }
 0xdef   :  { %998 = vrot.lane.b32.xlu1 %v2956_v0, %s2735_s21 }
 0xdf1   :  { %996 = vrot.lane.b32.xlu0 %v2958_v1, %s2735_s21 }
 0xdf3   :  { %1006 = vrot.lane.b32.xlu1 %v2996_v38, %s2736_s22  ;;  %v1854_v38 = vld [vmem:[#allocation7 + $0x8] sm:$0xff] }
 0xdf5   :  { %1004 = vrot.lane.b32.xlu0 %v2998_v39, %s2736_s22 }
 0xdf7   :  { %1827 = vrot.lane.b32.xlu1 %v3056_v8, %s2722_s10  ;;  %v2428_v8 = vpack.c.bf16 %v1854_v38, %v1853_v27 }
 0xdf9   :  { %1825 = vrot.lane.b32.xlu0 %v3058_v9, %s2722_s10 }
 0xdfb   :  { %1835 = vrot.lane.b32.xlu1 %v2311_v58, %s2735_s21 }
 0xdfd   :  { %1833 = vrot.lane.b32.xlu0 %v1612_v59, %s2735_s21 }
 0xe63   :  { %v1731_v62 = vpop.xlane.xlu1 %1730 }
 0xe64   :  { %2597 = vrcp.f32 %v1731_v62  ;;  %v1728_v63 = vpop.xlane.xlu0 %1727 }
 0xe65   :  { %2599 = vrcp.f32 %v1728_v63 }
 0xe67   :  { %v989_v0 = vpop.permute.xlu1 %988 }
 0xe68   :  { %v2534_v1 = vpop.permute.xlu0 %2533  ;;  %v1010_v45 = vsel %vm184_vm1, %v2950_v61, %v989_v0 }
 0xe69   :  { %v2536_v32 = vunpack.i.h.bf16 %v2534_v1  ;;  %v2535_v39 = vunpack.i.l.bf16 %v2534_v1 }
 0xe6b   :  { %v2424_v33 = vpack.c.bf16 %v2536_v32, %v2535_v39  ;;  %v991_v34 = vpop.permute.xlu1 %990 }
 0xe6c   :  { %v997_v35 = vpop.permute.xlu0 %996  ;;  %v1011_v52 = vsel %vm184_vm1, %v2948_v60, %v991_v34  ;;  %v3131_v60 = vld [vmem:[%s3211_s4] ss:$0 sm:$0xff]  ;;  %s2738_s4 = smov [#allocation9]  }
 0xe6d   :  { %2425 = vmatprep.subr.bf16.mxu0 %v2424_v33  ;;  %v1012_v50 = vsel %vm270_vm3, %v1010_v45, %v997_v35  ;;  %s2045_s27 = sshll.u32 %s2738_s4, 4  ;;  %s2046_s27 = int_to_ptr.vmem [resolvable:$true] %s2045_s27 }
 0xe6e   :  { %v2598_v9 = vpop.eup %2597  ;;  %2427 = vmatpush3.bf16.msra.mxu0 %v2424_v33  ;;  %s2667_s28 = scalar_lea.vmem %s2046_s27, 256  ;;  %p2672_p11 = scmp.lt.s32.totalorder %s2046_s27, %s2046_s27 }
 0xe6f   :  { %v2600_v40 = vpop.eup %2599  ;;  %2429 = vmatprep.subr.bf16.mxu0 %v2428_v8  ;;  %v1735_v14 = vmul.f32 %v2598_v9, %v2594_v30  ;;  %v999_v46 = vpop.permute.xlu1 %998  ;;  %p2668_p10 = scmp.ne.s32.totalorder %s2046_s27, %s2667_s28  ;;  %p2673_p12 = scmp.lt.s32.totalorder %s2667_s28, %s2667_s28 }
 0xe70   :  { %v1005_v41 = vpop.permute.xlu0 %1004  ;;  %v1734_v42 = vmul.f32 %v2600_v40, %v2596_v31  ;;  %v1013_v61 = vsel %vm270_vm3, %v1011_v52, %v999_v46 }
 0xe71   :  { %v1015_v51 = vsel %vm1014_vm4, %v1012_v50, %v1005_v41  ;;  %p2674_p13 = por %p2673_p12, %p2672_p11 }
 0xe72   :  { %2323 = vmatprep.mubr.msk.f32.mxu0 %vm270_vm3, %v1734_v42 }
 0xe73   :  { %2324 = vmatmul.mubr.msk.f32.vlgmr.msra.gmra.mrb[12].mxu0 %vm270_vm3, %v1735_v14  ;;  %v1007_v26 = vpop.permute.xlu1 %1006  ;;  %p2675_p0 = pnand %p2674_p13, %p2668_p10 }
 0xe74   :  { %2431 = vmatpush3.bf16.msra.mxu0 %v2428_v8  ;;  %2334 = vmatprep.mubr.msk.f32.mxu0 %vm80_vm0, %v1015_v51  ;;  %v1016_v55 = vsel %vm1014_vm4, %v1013_v61, %v1007_v26 }
 0xe75   :  { %2433 = vmatprep.subr.bf16.mxu0 %v2432_v47 }
 0xe78   :  { %2435 = vmatpush3.bf16.msra.mxu0 %v2432_v47 }
 0xe7b   :  { %2335 = vmatmul.mubr.msk.f32.vlgmr.msra.gmra.mrb[14].mxu0 %vm80_vm0, %v1016_v55 }
 0xf46   :  { %v2325_v56 = vpop.f32.mrb[12].mxu0 }
 0xf47   :  { %1843 = vrot.lane.b32.xlu1 %v2325_v56, %s2736_s22  ;;  %v1814_v58 = vpop.f32.mrb[13].mxu0 }
 0xf48   :  { %1841 = vrot.lane.b32.xlu0 %v1814_v58, %s2736_s22 }
 0xf4b   :  { %1967 = vrot.lane.b32.xlu1 %v2928_v49, %s2735_s21  ;;  %v1826_v49 = vpop.permute.xlu0 %1825 }
 0xf4c   :  { %1965 = vrot.lane.b32.xlu0 %v2926_v48, %s2735_s21  ;;  %v1828_v48 = vpop.permute.xlu1 %1827 }
 0xf4e   :  { %v2336_v59 = vpop.f32.mrb[14].mxu0 }
 0xf4f   :  { %v1948_v2 = vadd.f32 %v2336_v59, %v3131_v60  ;;  %v1942_v3 = vpop.f32.mrb[15].mxu0  ;;  %1973 = vrot.lane.b32.xlu1 %v2940_v57, %s2737_s26  ;;  %v1834_v57 = vpop.permute.xlu0 %1833 }
 0xf50   :  { %v1943_v6 = vadd.f32 %v3131_v60, %v1942_v3  ;;  %1971 = vrot.lane.b32.xlu0 %v2936_v54, %s2737_s26  ;;  %v1836_v54 = vpop.permute.xlu1 %1835 }
 0xf51   :  { %1962 = vst.msk [vmem:[#allocation8 + $0x8] sm:$0xff] %vm80_vm0, %v1948_v2 }
 0xf52   :  { %1961 = vst.msk [vmem:[#allocation8] sm:$0xff] %vm80_vm0, %v1943_v6 }
 0xf53   :  { %1979 = vrot.lane.b32.xlu1 %v2984_v37, %s2731_s18 }
 0xf54   :  { %1977 = vrot.lane.b32.xlu0 %v2982_v15, %s2731_s18  ;;  %v1847_v15 = vsel %vm184_vm1, %v3028_v29, %v1826_v49 }
 0xf57   :  { %1985 = vrot.lane.b32.xlu1 %v3016_v21, %s2730_s17  ;;  %v1849_v21 = vsel %vm270_vm3, %v1847_v15, %v1834_v57 }
 0xf58   :  { %1983 = vrot.lane.b32.xlu0 %v3014_v20, %s2730_s17  ;;  %v1848_v20 = vsel %vm184_vm1, %v3026_v28, %v1828_v48 }
 0xf5b   :  { %1991 = vrot.lane.b32.xlu1 %v3046_v5, %s2726_s13  ;;  %v1850_v5 = vsel %vm270_vm3, %v1848_v20, %v1836_v54 }
 0xf5c   :  { %1989 = vrot.lane.b32.xlu0 %v3044_v4, %s2726_s13 }
 0xf5f   :  { %1997 = vrot.lane.b32.xlu1 %v3076_v53, %s2725_s2 }
 0xf60   :  { %1995 = vrot.lane.b32.xlu0 %v3074_v25, %s2725_s2 }
 0xf63   :  { %2003 = vrot.lane.b32.xlu1 %v1735_v14, %s2728_s15 }
 0xf64   :  { %2001 = vrot.lane.b32.xlu0 %v1734_v42, %s2728_s15 }
 0xfb9   :  { %v1844_v37 = vpop.permute.xlu1 %1843 }
 0xfba   :  { %v1842_v4 = vpop.permute.xlu0 %1841  ;;  %v1852_v53 = vsel %vm1014_vm4, %v1850_v5, %v1844_v37 }
 0xfbb   :  { %v1851_v25 = vsel %vm1014_vm4, %v1849_v21, %v1842_v4 }
 0xfbc   :  { %2337 = vmatprep.mubr.msk.f32.mxu0 %vm80_vm0, %v1851_v25 }
 0xfbd   :  { %2338 = vmatmul.mubr.msk.f32.gmra.mrb[16].mxu0 %vm80_vm0, %v1852_v53  ;;  %v1968_v7 = vpop.permute.xlu1 %1967 }
 0xfbe   :  { %v1966_v11 = vpop.permute.xlu0 %1965  ;;  %v2008_v16 = vsel %vm270_vm3, %v2920_v44, %v1968_v7 }
 0xfbf   :  { %v2007_v30 = vsel %vm270_vm3, %v2918_v43, %v1966_v11 }
 0xfc1   :  { %v1974_v29 = vpop.permute.xlu1 %1973 }
 0xfc2   :  { %v1972_v13 = vpop.permute.xlu0 %1971  ;;  %v2010_v31 = vsel %vm80_vm0, %v2008_v16, %v1974_v29 }
 0xfc3   :  { %v2009_v17 = vsel %vm80_vm0, %v2007_v30, %v1972_v13 }
 0xfc5   :  { %v1980_v18 = vpop.permute.xlu1 %1979 }
 0xfc6   :  { %v1978_v19 = vpop.permute.xlu0 %1977  ;;  %v2013_v62 = vsel %vm2011_vm5, %v2010_v31, %v1980_v18 }
 0xfc7   :  { %v2012_v0 = vsel %vm2011_vm5, %v2009_v17, %v1978_v19 }
 0xfc9   :  { %v1986_v28 = vpop.permute.xlu1 %1985 }
 0xfca   :  { %v1984_v22 = vpop.permute.xlu0 %1983  ;;  %v2016_v1 = vsel %vm2014_vm6, %v2013_v62, %v1986_v28 }
 0xfcb   :  { %v2015_v27 = vsel %vm2014_vm6, %v2012_v0, %v1984_v22 }
 0xfcd   :  { %v1992_v23 = vpop.permute.xlu1 %1991 }
 0xfce   :  { %v1990_v24 = vpop.permute.xlu0 %1989  ;;  %v2019_v38 = vsel %vm2017_vm7, %v2016_v1, %v1992_v23 }
 0xfcf   :  { %v2018_v32 = vsel %vm2017_vm7, %v2015_v27, %v1990_v24 }
 0xfd1   :  { %v1998_v10 = vpop.permute.xlu1 %1997 }
 0xfd2   :  { %v1996_v63 = vpop.permute.xlu0 %1995  ;;  %v2022_v44 = vsel %vm2020_vm8, %v2019_v38, %v1998_v10 }
 0xfd3   :  { %v2021_v33 = vsel %vm2020_vm8, %v2018_v32, %v1996_v63 }
 0xfd5   :  { %v2004_v39 = vpop.permute.xlu1 %2003 }
 0xfd6   :  { %v2025_v34 = vsel %vm2023_vm9, %v2022_v44, %v2004_v39  ;;  %v2002_v43 = vpop.permute.xlu0 %2001 }
 0xfd7   :  { %2027 = vst [vmem:[#allocation9 + $0x8] sm:$0xff] %v2025_v34  ;;  %v2024_v8 = vsel %vm2023_vm9, %v2021_v33, %v2002_v43 }
 0xfd8   :  { %2026 = vst [vmem:[#allocation9] sm:$0xff] %v2024_v8 }
 0xfd9   :  { %2678 = shalt.err (!%p2675_p0)
}
 0xfda   :  { %s2679_s7 = scalar_lea.hbm %s3213_s6, 256 }
 0xfdb   :  { %p2680_p1 = scmp.ne.s32.totalorder %s3213_s6, %s2679_s7  ;;  %p2683_p2 = scmp.lt.u32.totalorder %s2679_s7, %s3213_s6 }
 0xfdd   :  { %p2685_p3 = pnand %p2683_p2, %p2680_p1 }
 0xfdf   :  { %2688 = shalt.err (!%p2685_p3)
}
 0xfe0   :  { %2051 = dma.vmem_to_hbm [thread:$0]  %s2046_s27, 256, %s3213_s6, [#allocation10], %s2721_s9, %s2721_s9, %s2722_s10  }
 0xfe1   :  { %s2739_s2 = smov [#allocation8]  }
 0xfe2   :  { %s2033_s13 = sshll.u32 %s2739_s2, 4  ;;  %s2034_s13 = int_to_ptr.vmem [resolvable:$true] %s2033_s13 }
 0xfe3   :  { %s2689_s14 = scalar_lea.vmem %s2034_s13, 512  ;;  %p2694_p5 = scmp.lt.s32.totalorder %s2034_s13, %s2034_s13 }
 0xfe4   :  { %p2690_p4 = scmp.ne.s32.totalorder %s2034_s13, %s2689_s14  ;;  %p2695_p6 = scmp.lt.s32.totalorder %s2689_s14, %s2689_s14 }
 0xfe6   :  { %p2696_p7 = por %p2695_p6, %p2694_p5 }
 0xfe8   :  { %p2697_p8 = pnand %p2696_p7, %p2690_p4 }
0x1090   :  { %v2339_v35 = vpop.f32.mrb[16].mxu0 }
0x1091   :  { %v1958_v9 = vadd.f32 %v2339_v35, %v3131_v60  ;;  %v1952_v36 = vpop.f32.mrb[17].mxu0 }
0x1092   :  { %v1953_v12 = vadd.f32 %v3131_v60, %v1952_v36 }
0x1093   :  { %1964 = vst.msk [vmem:[#allocation8 + $0x18] sm:$0xff] %vm80_vm0, %v1958_v9 }
0x1094   :  { %1963 = vst.msk [vmem:[#allocation8 + $0x10] sm:$0xff] %vm80_vm0, %v1953_v12 }
0x1095   :  { %2700 = shalt.err (!%p2697_p8)
}
0x1096   :  { %s2701_s16 = scalar_lea.hbm %s3212_s5, 512 }
0x1097   :  { %p2702_p9 = scmp.ne.s32.totalorder %s3212_s5, %s2701_s16  ;;  %p2705_p10 = scmp.lt.u32.totalorder %s2701_s16, %s3212_s5 }
0x1099   :  { %p2707_p11 = pnand %p2705_p10, %p2702_p9 }
0x109b   :  { %2710 = shalt.err (!%p2707_p11)
}
0x109c   :  { %2039 = dma.vmem_to_hbm [thread:$0]  %s2034_s13, 512, %s3212_s5, [#allocation4], %s2721_s9, %s2721_s9, %s2722_s10  }
0x109d   :  { %2715 = dma.done.wait [#allocation4], 512  }
0x109e   :  { %2716 = vsyncadd [#allocation4], 4294966784 }
0x109f   :  { %2717 = dma.done.wait [#allocation10], 256  }
0x10a0   :  { %2718 = vsyncadd [#allocation10], 4294967040 }
0x10a1   :  { %2058 = vsyncpa [#allocation3], 1 }
0x10a2   :  { %2059 = vsyncpa [#allocation6], 1 }
0x10a3   :  { %2060 = vsyncpa [#allocation4], 1 }
0x10a4   :  { %2061 = vsyncpa [#allocation10], 1 }

</bundles_post_ra>
